<compile_context>
chip_gen: v5e
topology: v5e:2x2
jax: 0.10.0
libtpu: 0.0.40
codegen_flags: <defaults>
</compile_context>

<pallas_src>
import functools

import jax
import jax.numpy as jnp
from jax.experimental import pallas as pl
from jax.experimental.pallas import tpu as pltpu


def _linear_gate_tanh(x, h, w_t, b, *, n, f_in, f_out):
    """tanh( dg(x @ W^T + b) + h ), K=f_in contraction unrolled on the VPU."""
    y = jnp.broadcast_to(b, (n, f_out))              # hoisted bias broadcast
    for k in range(f_in):                            # static, fully unrolled
        y = y + x[:, k:k + 1] * w_t[k:k + 1, :]
    # MyDecisionGate: y if y.sum() > 0 else -y  ->  scalar sign multiply.
    sign = jnp.where(jnp.sum(y) > jnp.float32(0.0),
                     jnp.float32(1.0), jnp.float32(-1.0))
    return jnp.tanh(y * sign + h)


# --------------------------- single MyCell step -----------------------------
def mycell_kernel(x_ref, h_ref, wt_ref, b_ref, out_ref, *, n, f_in, f_out):
    out_ref[...] = _linear_gate_tanh(
        x_ref[...], h_ref[...], wt_ref[...], b_ref[...],
        n=n, f_in=f_in, f_out=f_out)


def mycell_forward(x, h, weight, bias):
    """The module's forward. x,h: (N,F); weight: (F,F) torch (out,in); bias: (F,)."""
    n, f_in = x.shape
    f_out = weight.shape[0]

    x = x.astype(jnp.float32)
    h = h.astype(jnp.float32)
    w_t = weight.T.astype(jnp.float32)                # pre-transposed once, outside
    b = bias.reshape(1, f_out).astype(jnp.float32)

    full = lambda shape: pl.BlockSpec(shape, lambda: (0,) * len(shape))
    kernel = functools.partial(mycell_kernel, n=n, f_in=f_in, f_out=f_out)

    # grid=() keeps the decision-gate sum global (PyTorch semantics).
    new_h = pl.pallas_call(
        kernel,
        out_shape=jax.ShapeDtypeStruct((n, f_out), jnp.float32),
        grid=(),
        in_specs=[full((n, f_in)), full((n, f_out)),
                  full((f_in, f_out)), full((1, f_out))],
        out_specs=full((n, f_out)),
    )(x, h, w_t, b)

    return new_h, new_h                               # module returns it twice


# ------------------- fused T-step loop (one pallas_call) --------------------
def mycell_rnn_kernel(x_ref, h0_ref, wt_ref, b_ref, out_ref, h_scr,
                      *, n, f_in, f_out):
    t = pl.program_id(0)

    @pl.when(t == 0)
    def _():
        h_scr[...] = h0_ref[...]                      # seed the carried state

    new_h = _linear_gate_tanh(
        x_ref[0], h_scr[...], wt_ref[...], b_ref[...],
        n=n, f_in=f_in, f_out=f_out)
    h_scr[...] = new_h                                # carry h in VMEM scratch
    out_ref[0] = new_h


def mycell_rnn_forward(xs, h0, weight, bias):
    """T MyCell steps fused into one pallas_call. xs: (T,N,F); h0: (N,F)."""
    t_steps, n, f_in = xs.shape
    f_out = weight.shape[0]

    xs = xs.astype(jnp.float32)
    h0 = h0.astype(jnp.float32)
    w_t = weight.T.astype(jnp.float32)
    b = bias.reshape(1, f_out).astype(jnp.float32)

    kernel = functools.partial(mycell_rnn_kernel, n=n, f_in=f_in, f_out=f_out)

    new_hs = pl.pallas_call(
        kernel,
        out_shape=jax.ShapeDtypeStruct((t_steps, n, f_out), jnp.float32),
        grid=(t_steps,),
        in_specs=[
            pl.BlockSpec((1, n, f_in), lambda t: (t, 0, 0)),   # x[t]: pipelined
            pl.BlockSpec((n, f_out), lambda t: (0, 0)),        # h0: resident
            pl.BlockSpec((f_in, f_out), lambda t: (0, 0)),     # W^T: resident
            pl.BlockSpec((1, f_out), lambda t: (0, 0)),        # bias: resident
        ],
        out_specs=pl.BlockSpec((1, n, f_out), lambda t: (t, 0, 0)),
        scratch_shapes=[pltpu.VMEM((n, f_out), jnp.float32)],  # carried h
        compiler_params=pltpu.CompilerParams(
            dimension_semantics=("arbitrary",)),               # sequential carry
    )(xs, h0, w_t, b)

    return new_hs, new_hs[-1]


if __name__ == "__main__":
    key = jax.random.PRNGKey(0)
    kx, kh, kw, kb, ks = jax.random.split(key, 5)

    N, F = 3, 4              # tutorial shapes: x, h ~ rand(3, 4); Linear(4, 4)
    T = 8                    # timesteps for the fused-loop variant

    x = jax.random.uniform(kx, (N, F), dtype=jnp.float32)
    h = jax.random.uniform(kh, (N, F), dtype=jnp.float32)

    bound = 1.0 / jnp.sqrt(jnp.float32(F))
    weight = jax.random.uniform(kw, (F, F), dtype=jnp.float32,
                                minval=-bound, maxval=bound)
    bias = jax.random.uniform(kb, (F,), dtype=jnp.float32,
                              minval=-bound, maxval=bound)

    def ref_step(x_, h_):
        y = x_ @ weight.T + bias
        y = jnp.where(jnp.sum(y) > 0.0, y, -y)
        return jnp.tanh(y + h_)

    # ---- single-step (the module's forward) --------------------------------
    new_h, new_h2 = mycell_forward(x, h, weight, bias)
    jax.block_until_ready(new_h)

    ref = ref_step(x, h)
    assert jnp.allclose(new_h, ref, atol=1e-5, rtol=1e-5)
    assert jnp.allclose(new_h2, ref, atol=1e-5, rtol=1e-5)

    # ---- fused T-step loop (performance-feedback variant) ------------------
    xs = jax.random.uniform(ks, (T, N, F), dtype=jnp.float32)
    new_hs, final_h = mycell_rnn_forward(xs, h, weight, bias)
    jax.block_until_ready(new_hs)

    h_ref = h
    for t in range(T):
        h_ref = ref_step(xs[t], h_ref)
        assert jnp.allclose(new_hs[t], h_ref, atol=1e-5, rtol=1e-5)
    assert jnp.allclose(final_h, h_ref, atol=1e-5, rtol=1e-5)

    print("KERNEL_OK")
</pallas_src>

<mosaic_0001>
module attributes {stable_mosaic.version = 11 : i64} {
  func.func @mycell_kernel(%arg0: memref<3x4xf32, #tpu.memory_space<vmem>>, %arg1: memref<3x4xf32, #tpu.memory_space<vmem>>, %arg2: memref<4x4xf32, #tpu.memory_space<vmem>>, %arg3: memref<1x4xf32, #tpu.memory_space<vmem>>, %arg4: memref<3x4xf32, #tpu.memory_space<vmem>>) attributes {dimension_semantics = [], scalar_prefetch = 0 : i64, scratch_operands = 0 : i64, tpu.core_type = #tpu.core_type<tc>} {
    %c0 = arith.constant 0 : index
    %c0_0 = arith.constant 0 : index
    %0 = vector.load %arg0[%c0, %c0_0] : memref<3x4xf32, #tpu.memory_space<vmem>>, vector<3x4xf32>
    %c0_1 = arith.constant 0 : index
    %c0_2 = arith.constant 0 : index
    %1 = vector.load %arg1[%c0_1, %c0_2] : memref<3x4xf32, #tpu.memory_space<vmem>>, vector<3x4xf32>
    %c0_3 = arith.constant 0 : index
    %c0_4 = arith.constant 0 : index
    %2 = vector.load %arg2[%c0_3, %c0_4] : memref<4x4xf32, #tpu.memory_space<vmem>>, vector<4x4xf32>
    %c0_5 = arith.constant 0 : index
    %c0_6 = arith.constant 0 : index
    %3 = vector.load %arg3[%c0_5, %c0_6] : memref<1x4xf32, #tpu.memory_space<vmem>>, vector<1x4xf32>
    %4 = vector.shape_cast %3 : vector<1x4xf32> to vector<1x4xf32>
    %5 = vector.broadcast %4 : vector<1x4xf32> to vector<3x4xf32>
    %6 = vector.extract_strided_slice %0 {offsets = [0, 0], sizes = [3, 1], strides = [1, 1]} : vector<3x4xf32> to vector<3x1xf32>
    %7 = vector.extract_strided_slice %2 {offsets = [0, 0], sizes = [1, 4], strides = [1, 1]} : vector<4x4xf32> to vector<1x4xf32>
    %8 = vector.broadcast %6 : vector<3x1xf32> to vector<3x4xf32>
    %9 = vector.broadcast %7 : vector<1x4xf32> to vector<3x4xf32>
    %10 = arith.mulf %8, %9 : vector<3x4xf32>
    %11 = arith.addf %5, %10 : vector<3x4xf32>
    %12 = vector.extract_strided_slice %0 {offsets = [0, 1], sizes = [3, 1], strides = [1, 1]} : vector<3x4xf32> to vector<3x1xf32>
    %13 = vector.extract_strided_slice %2 {offsets = [1, 0], sizes = [1, 4], strides = [1, 1]} : vector<4x4xf32> to vector<1x4xf32>
    %14 = vector.broadcast %12 : vector<3x1xf32> to vector<3x4xf32>
    %15 = vector.broadcast %13 : vector<1x4xf32> to vector<3x4xf32>
    %16 = arith.mulf %14, %15 : vector<3x4xf32>
    %17 = arith.addf %11, %16 : vector<3x4xf32>
    %18 = vector.extract_strided_slice %0 {offsets = [0, 2], sizes = [3, 1], strides = [1, 1]} : vector<3x4xf32> to vector<3x1xf32>
    %19 = vector.extract_strided_slice %2 {offsets = [2, 0], sizes = [1, 4], strides = [1, 1]} : vector<4x4xf32> to vector<1x4xf32>
    %20 = vector.broadcast %18 : vector<3x1xf32> to vector<3x4xf32>
    %21 = vector.broadcast %19 : vector<1x4xf32> to vector<3x4xf32>
    %22 = arith.mulf %20, %21 : vector<3x4xf32>
    %23 = arith.addf %17, %22 : vector<3x4xf32>
    %24 = vector.extract_strided_slice %0 {offsets = [0, 3], sizes = [3, 1], strides = [1, 1]} : vector<3x4xf32> to vector<3x1xf32>
    %25 = vector.extract_strided_slice %2 {offsets = [3, 0], sizes = [1, 4], strides = [1, 1]} : vector<4x4xf32> to vector<1x4xf32>
    %26 = vector.broadcast %24 : vector<3x1xf32> to vector<3x4xf32>
    %27 = vector.broadcast %25 : vector<1x4xf32> to vector<3x4xf32>
    %28 = arith.mulf %26, %27 : vector<3x4xf32>
    %29 = arith.addf %23, %28 : vector<3x4xf32>
    %30 = vector.shape_cast %29 : vector<3x4xf32> to vector<1x3x4xf32>
    %cst = arith.constant dense<0.000000e+00> : vector<1xf32>
    %31 = vector.multi_reduction <add>, %30, %cst [1, 2] : vector<1x3x4xf32> to vector<1xf32>
    %32 = vector.shape_cast %31 : vector<1xf32> to vector<1x1x1xf32>
    %33 = vector.extract %32[0, 0, 0] : f32 from vector<1x1x1xf32>
    %cst_7 = arith.constant 0.000000e+00 : f32
    %34 = arith.cmpf ogt, %33, %cst_7 : f32
    %cst_8 = arith.constant 1.000000e+00 : f32
    %cst_9 = arith.constant -1.000000e+00 : f32
    %35 = arith.select %34, %cst_8, %cst_9 : f32
    %36 = vector.broadcast %35 : f32 to vector<3x4xf32>
    %37 = arith.mulf %29, %36 : vector<3x4xf32>
    %38 = arith.addf %37, %1 : vector<3x4xf32>
    %39 = math.tanh %38 : vector<3x4xf32>
    %c0_10 = arith.constant 0 : index
    %c0_11 = arith.constant 0 : index
    %40 = vector.load %arg4[%c0_10, %c0_11] : memref<3x4xf32, #tpu.memory_space<vmem>>, vector<3x4xf32>
    tpu.vector_store %arg4[%c0_10, %c0_11], %39 {strides = array<i32>} : memref<3x4xf32, #tpu.memory_space<vmem>>, vector<3x4xf32>,
    return
  }
}

</mosaic_0001>

<bundles_post_ra>
// kernel: tpu_custom_call.1
= control target key start
LH: loop header
LB: loop body
LE: loop exit
PB: predicated region body
PF: predicated region fallthrough
CT: control target
= control target key end

     0   :  { %9 = vsyncpa [#allocation3], 0  ;;  %s301_s0 = inlined_call_operand.hbm [shape: f32[3,4], index: 0, kind: input, shape index: {}]   ;;  %s302_s1 = inlined_call_operand.hbm [shape: f32[3,4], index: 1, kind: input, shape index: {}]   ;;  %s303_s2 = inlined_call_operand.hbm [shape: f32[4,4], index: 2, kind: input, shape index: {}]   ;;  %s304_s3 = inlined_call_operand.vmem [shape: f32[1,4], index: 3, kind: input, shape index: {}]   ;;  %s305_s4 = inlined_call_operand.hbm [shape: f32[3,4], index: 4, kind: output, shape index: {}]  }
   0x1   :  { %10 = vsyncpa [#allocation6], 0  ;;  %s28_s17 = sshll.u32 %s302_s1, 4  ;;  %s29_s17 = int_to_ptr.hbm [resolvable:$true] %s28_s17 }
   0x2   :  { %11 = vsyncpa [#allocation4], 0  ;;  %s251_s18 = smov [#allocation5]   ;;  %s17_s22 = sshll.u32 %s301_s0, 4  ;;  %s18_s22 = int_to_ptr.hbm [resolvable:$true] %s17_s22 }
   0x3   :  { %s30_s19 = sshll.u32 %s251_s18, 4  ;;  %s252_s23 = smov [#allocation2]   ;;  %s31_s19 = int_to_ptr.vmem [resolvable:$true] %s30_s19 }
   0x4   :  { %33 = dma.hbm_to_vmem [thread:$0]  %s29_s17, 64, %s31_s19, [#allocation6]  }
   0x5   :  { %s19_s24 = sshll.u32 %s252_s23, 4  ;;  %s39_s27 = sshll.u32 %s303_s2, 4  ;;  %s20_s24 = int_to_ptr.vmem [resolvable:$true] %s19_s24  ;;  %s40_s27 = int_to_ptr.hbm [resolvable:$true] %s39_s27 }
   0x6   :  { %22 = dma.hbm_to_vmem [thread:$0]  %s18_s22, 64, %s20_s24, [#allocation3]  }
   0x7   :  { %s253_s1 = smov [#allocation7]  }
   0x8   :  { %s41_s28 = sshll.u32 %s253_s1, 4  ;;  %s42_s28 = int_to_ptr.vmem [resolvable:$true] %s41_s28 }
   0x9   :  { %44 = dma.hbm_to_vmem [thread:$0]  %s40_s27, 64, %s42_s28, [#allocation6]  }
   0xa   :  { %245 = dma.done.wait [#allocation3], 64  }
   0xb   :  { %246 = vsyncadd [#allocation3], 4294967232 }
   0xc   :  { %247 = dma.done.wait [#allocation6], 128  }
   0xd   :  { %248 = vsyncadd [#allocation6], 4294967168  ;;  %v254_v0 = vmov 0   ;;  %v255_v1 = vmov 2   ;;  %v59_v2 = vld [vmem:[#allocation2] sm:$0x7] }
   0xe   :  { %141 = vset.pattern.permute.xlu0 %v254_v0  ;;  %143 = vset.pattern.permute.xlu1 %v255_v1  ;;  %v256_v3 = vmov 1   ;;  %v257_v4 = vmov 3   ;;  %v61_v5 = vld [vmem:[#allocation7] sm:$0xf]  ;;  %v146_v9 = vld [vmem:[%s304_s3] ss:$0 sm:$0xff] }
   0xf   :  { %68 = vperm.xlu0 %141, %v59_v2   ;;  %82 = vperm.xlu1 %143, %v59_v2   ;;  %v71_v8 = vperm.slane %v61_v5, 0  ;;  %v78_v11 = vperm.slane %v61_v5, 1  ;;  %v85_v12 = vperm.slane %v61_v5, 2  ;;  %v92_v13 = vperm.slane %v61_v5, 3  ;;  %v60_v31 = vld [vmem:[#allocation5] sm:$0x7] }
  0x10   :  { %vm95_vm0 = vcmask 26624   ;;  %s258_s30 = smov [#allocation8]   ;;  %s120_s8 = sshll.u32 %s305_s4, 4  ;;  %s121_s8 = int_to_ptr.hbm [resolvable:$true] %s120_s8 }
  0x11   :  { %s118_s5 = sshll.u32 %s258_s30, 4  ;;  %s119_s5 = int_to_ptr.vmem [resolvable:$true] %s118_s5 }
  0x17   :  { %142 = vset.pattern.permute.xlu0 %v256_v3  ;;  %144 = vset.pattern.permute.xlu1 %v257_v4 }
  0x18   :  { %75 = vperm.xlu0 %142, %v59_v2   ;;  %89 = vperm.xlu1 %144, %v59_v2  }
  0x20   :  { %145 = vset.pattern.permute.xlu0 %v257_v4 }
  0x81   :  { %v69_v6 = vpop.permute.xlu0 %68  ;;  %v83_v7 = vpop.permute.xlu1 %82 }
  0x82   :  { %v72_v10 = vmul.f32 %v71_v8, %v69_v6  ;;  %v86_v18 = vmul.f32 %v85_v12, %v83_v7 }
  0x84   :  { %v73_v16 = vadd.f32 %v146_v9, %v72_v10 }
  0x8a   :  { %v76_v14 = vpop.permute.xlu0 %75  ;;  %v90_v15 = vpop.permute.xlu1 %89 }
  0x8b   :  { %v79_v17 = vmul.f32 %v78_v11, %v76_v14  ;;  %v93_v20 = vmul.f32 %v92_v13, %v90_v15 }
  0x8d   :  { %v80_v19 = vadd.f32 %v79_v17, %v73_v16 }
  0x8f   :  { %v87_v21 = vadd.f32 %v86_v18, %v80_v19 }
  0x91   :  { %v94_v22 = vadd.f32 %v93_v20, %v87_v21 }
  0x93   :  { %v96_v23 = vsel %vm95_vm0, %v94_v22, 0.0 }
  0x94   :  { %97 = vadd.xlane.f32.xlu2 %v96_v23 }
 0x107   :  { %v98_v24 = vpop.xlane.xlu2 %97 }
 0x108   :  { %v99_v25 = vrot.slane %v98_v24, 4 }
 0x10a   :  { %v100_v26 = vadd.f32 %v99_v25, %v98_v24 }
 0x10c   :  { %v101_v27 = vrot.slane %v100_v26, 2 }
 0x10e   :  { %v102_v28 = vadd.f32 %v101_v27, %v100_v26 }
 0x110   :  { %v103_v29 = vrot.slane %v102_v28, 1 }
 0x112   :  { %v104_v30 = vadd.f32 %v103_v29, %v102_v28 }
 0x114   :  { %131 = vpush %v104_v30 }
 0x145   :  { %s132_s3 = spop %131 }
 0x146   :  { %p106_p0 = scmp.gt.f32.partialorder %s132_s3, 0.0 }
 0x148   :  { %s107_s29 = scalar_select %p106_p0, 1.0, -1.0 }
 0x14a   :  { %v108_v32 = vstv %s107_s29 }
 0x14b   :  { %v109_v33 = vmul.f32 %v108_v32, %v94_v22 }
 0x14d   :  { %v110_v34 = vadd.f32 %v109_v33, %v60_v31 }
 0x14f   :  { %147 = vtanh.f32 %v110_v34 }
 0x155   :  { %v148_v35 = vpop.eup %147 }
 0x156   :  { %112 = vst.msk [vmem:[#allocation8] sm:$0x7] %vm95_vm0, %v148_v35 }
 0x157   :  { %123 = dma.vmem_to_hbm [thread:$0]  %s119_s5, 64, %s121_s8, [#allocation4]  }
 0x158   :  { %249 = dma.done.wait [#allocation4], 64  }
 0x159   :  { %250 = vsyncadd [#allocation4], 4294967232 }
 0x15a   :  { %128 = vsyncpa [#allocation3], 1 }
 0x15b   :  { %129 = vsyncpa [#allocation6], 1 }
 0x15c   :  { %130 = vsyncpa [#allocation4], 1 }

</bundles_post_ra>
